<compile_context>
chip_gen: v7x
topology: tpu7x:2x2x1
jax: 0.10.0
libtpu: 0.0.40
codegen_flags: <defaults>
</compile_context>

<pallas_src>
import jax
import jax.numpy as jnp
from jax.experimental import pallas as pl
from jax.experimental.pallas import tpu as pltpu


LATENT = 100
HIDDEN = 256
OUT = 28 * 28        # 784
ROW_ALIGN = 16       # keeps bf16 sublane packing clean on the batch axis


def _round_up(n, m):
    return ((n + m - 1) // m) * m


def _cdiv(a, b):
    return (a + b - 1) // b


def generator_kernel(x_ref, w1_ref, b1_ref, w2_ref, b2_ref, w3_ref, b3_ref,
                     o_ref):
    # Layer 1: Linear(100 -> 256) + ReLU. Kept in f32 (odd K=100, ~10% of
    # FLOPs; the kernel is HBM-bound so the f32 MXU pass is essentially free
    # and x keeps full f32 parity with the PyTorch module).
    h1 = jnp.dot(x_ref[...], w1_ref[...],
                 preferred_element_type=jnp.float32) + b1_ref[...]
    h1 = jnp.maximum(h1, 0.0)

    # Layer 2: Linear(256 -> 256) + ReLU. bf16 operands, f32 accumulate.
    h2 = jnp.dot(h1.astype(jnp.bfloat16), w2_ref[...],
                 preferred_element_type=jnp.float32) + b2_ref[...]
    h2 = jnp.maximum(h2, 0.0)

    # Layer 3: Linear(256 -> 784), no activation. bf16 store halves the
    # output writeback bytes (the dominant HBM traffic).
    o = jnp.dot(h2.astype(jnp.bfloat16), w3_ref[...],
                preferred_element_type=jnp.float32) + b3_ref[...]
    o_ref[...] = o.astype(o_ref.dtype)


def generator_forward(x, prepared_params, *, block_b=512):
    """x: [B, 100] float32 latent. Returns [B, 784] bfloat16."""
    w1, b1, w2, b2, w3, b3 = prepared_params
    B = x.shape[0]

    B_al = _round_up(max(B, 1), ROW_ALIGN)
    if B_al >= 256:
        # At least 2 grid steps so the "parallel" batch axis can shard across
        # v7x's two TensorCores; tiles capped at block_b rows (VMEM budget).
        TB = min(block_b, _round_up(_cdiv(B_al, 2), ROW_ALIGN))
    else:
        # Small-batch inference: no row padding beyond 16-row alignment.
        TB = B_al
    Bp = _round_up(B_al, TB)
    grid = (Bp // TB,)

    # Row-pad (batch) only; no column pad / dtype cast in the wrapper.
    xp = x if Bp == B else jnp.pad(x, ((0, Bp - B), (0, 0)))

    def _nbytes(a):
        return a.size * a.dtype.itemsize

    flops = 2 * Bp * (LATENT * HIDDEN + HIDDEN * HIDDEN + HIDDEN * OUT)
    bytes_accessed = (
        Bp * LATENT * 4                 # f32 input activations
        + Bp * OUT * 2                  # bf16 output activations
        + sum(_nbytes(a) for a in (w1, b1, w2, b2, w3, b3)))  # resident params

    out = pl.pallas_call(
        generator_kernel,
        out_shape=jax.ShapeDtypeStruct((Bp, OUT), jnp.bfloat16),
        grid_spec=pltpu.PrefetchScalarGridSpec(
            num_scalar_prefetch=0,
            grid=grid,
            in_specs=[
                pl.BlockSpec((TB, LATENT), lambda i: (i, 0)),      # x tile
                pl.BlockSpec((LATENT, HIDDEN), lambda i: (0, 0)),  # w1 (f32)
                pl.BlockSpec((1, HIDDEN), lambda i: (0, 0)),       # b1
                pl.BlockSpec((HIDDEN, HIDDEN), lambda i: (0, 0)),  # w2 (bf16)
                pl.BlockSpec((1, HIDDEN), lambda i: (0, 0)),       # b2
                pl.BlockSpec((HIDDEN, OUT), lambda i: (0, 0)),     # w3 (bf16)
                pl.BlockSpec((1, OUT), lambda i: (0, 0)),          # b3
            ],
            out_specs=pl.BlockSpec((TB, OUT), lambda i: (i, 0)),
        ),
        compiler_params=pltpu.CompilerParams(
            dimension_semantics=("parallel",)),
        cost_estimate=pl.CostEstimate(
            flops=flops, transcendentals=0, bytes_accessed=bytes_accessed),
    )(xp, w1, b1, w2, b2, w3, b3)

    return out if Bp == B else out[:B]


def init_params(key):
    """Deterministic init matching PyTorch Linear defaults:
    U(-1/sqrt(fan_in), 1/sqrt(fan_in)) for weight and bias.
    Weights stored as [in, out] (transposed w.r.t. PyTorch), f32, unpadded."""
    def linear(key, fan_in, fan_out):
        kw, kb = jax.random.split(key)
        bound = 1.0 / jnp.sqrt(fan_in)
        w_t = jax.random.uniform(kw, (fan_in, fan_out), jnp.float32,
                                 -bound, bound)
        b = jax.random.uniform(kb, (1, fan_out), jnp.float32, -bound, bound)
        return w_t, b

    k1, k2, k3 = jax.random.split(key, 3)
    w1, b1 = linear(k1, LATENT, HIDDEN)
    w2, b2 = linear(k2, HIDDEN, HIDDEN)
    w3, b3 = linear(k3, HIDDEN, OUT)
    return (w1, b1, w2, b2, w3, b3)


def prepare_params(params):
    """No padding anywhere. w1 and all biases stay f32 (layer 1 runs in f32,
    bias adds are f32); w2/w3 are cast to bf16 for the MXU."""
    w1, b1, w2, b2, w3, b3 = params
    return (w1, b1, w2.astype(jnp.bfloat16), b2, w3.astype(jnp.bfloat16), b3)


def generator_reference_f32(x, params):
    """Pure-f32 reference of the original module."""
    w1, b1, w2, b2, w3, b3 = params
    h1 = jnp.maximum(x @ w1 + b1, 0.0)
    h2 = jnp.maximum(h1 @ w2 + b2, 0.0)
    return h2 @ w3 + b3


def generator_reference_mirror(x, params):
    """Reference mirroring the kernel numerics (f32 layer 1, bf16 operands
    with f32 accumulation for layers 2/3, bf16 final store)."""
    w1, b1, w2, b2, w3, b3 = params
    hi = jax.lax.Precision.HIGHEST
    f32 = jnp.float32
    h1 = jnp.maximum(jnp.dot(x, w1, precision=hi) + b1, 0.0)
    h2 = jnp.maximum(
        jnp.dot(h1.astype(jnp.bfloat16).astype(f32),
                w2.astype(jnp.bfloat16).astype(f32), precision=hi) + b2, 0.0)
    o = jnp.dot(h2.astype(jnp.bfloat16).astype(f32),
                w3.astype(jnp.bfloat16).astype(f32), precision=hi) + b3
    return o.astype(jnp.bfloat16)


if __name__ == "__main__":
    key = jax.random.PRNGKey(0)
    k_params, k_x, k_x2 = jax.random.split(key, 3)

    params = init_params(k_params)
    prepared = prepare_params(params)

    # Small-batch run (single grid step, 16-row tile).
    batch = 8
    x = jax.random.normal(k_x, (batch, LATENT), jnp.float32)
    out = generator_forward(x, prepared)
    out = jax.block_until_ready(out)

    assert out.shape == (batch, OUT), out.shape
    assert out.dtype == jnp.bfloat16, out.dtype
    out_f32 = out.astype(jnp.float32)

    # Tight check: reference mirroring the kernel's mixed-precision numerics.
    ref_m = generator_reference_mirror(x, params).astype(jnp.float32)
    assert jnp.allclose(out_f32, ref_m, atol=1e-2, rtol=1e-2), (
        float(jnp.max(jnp.abs(out_f32 - ref_m))))

    # Loose check: original pure-f32 module semantics (bf16 rounding only).
    ref_f = generator_reference_f32(x, params)
    assert jnp.allclose(out_f32, ref_f, atol=5e-2, rtol=5e-2), (
        float(jnp.max(jnp.abs(out_f32 - ref_f))))

    # Second run exercising the multi-tile grid path (2 steps) + row padding.
    batch2 = 272
    x2 = jax.random.normal(k_x2, (batch2, LATENT), jnp.float32)
    out2 = jax.block_until_ready(generator_forward(x2, prepared))
    assert out2.shape == (batch2, OUT), out2.shape
    ref2 = generator_reference_f32(x2, params)
    assert jnp.allclose(out2.astype(jnp.float32), ref2, atol=5e-2, rtol=5e-2), (
        float(jnp.max(jnp.abs(out2.astype(jnp.float32) - ref2))))

    print("KERNEL_OK")
</pallas_src>

<mosaic_0001>
module attributes {stable_mosaic.version = 11 : i64} {
  func.func @generator_kernel(%arg0: i32, %arg1: memref<16x100xf32, #tpu.memory_space<vmem>>, %arg2: memref<100x256xf32, #tpu.memory_space<vmem>>, %arg3: memref<1x256xf32, #tpu.memory_space<vmem>>, %arg4: memref<256x256xbf16, #tpu.memory_space<vmem>>, %arg5: memref<1x256xf32, #tpu.memory_space<vmem>>, %arg6: memref<256x784xbf16, #tpu.memory_space<vmem>>, %arg7: memref<1x784xf32, #tpu.memory_space<vmem>>, %arg8: memref<16x784xbf16, #tpu.memory_space<vmem>>) attributes {dimension_semantics = [#tpu.dimension_semantics<parallel>], iteration_bounds = array<i64: 1>, scalar_prefetch = 0 : i64, scratch_operands = 0 : i64, tpu.core_type = #tpu.core_type<tc>, window_params = [{transform_indices = @transform_0, window_bounds = array<i64: 16, 100>}, {pipeline_mode = #tpu.pipeline_mode<synchronous>, transform_indices = @transform_1, window_bounds = array<i64: 100, 256>}, {pipeline_mode = #tpu.pipeline_mode<synchronous>, transform_indices = @transform_2, window_bounds = array<i64: 1, 256>}, {pipeline_mode = #tpu.pipeline_mode<synchronous>, transform_indices = @transform_3, window_bounds = array<i64: 256, 256>}, {pipeline_mode = #tpu.pipeline_mode<synchronous>, transform_indices = @transform_4, window_bounds = array<i64: 1, 256>}, {pipeline_mode = #tpu.pipeline_mode<synchronous>, transform_indices = @transform_5, window_bounds = array<i64: 256, 784>}, {pipeline_mode = #tpu.pipeline_mode<synchronous>, transform_indices = @transform_6, window_bounds = array<i64: 1, 784>}, {transform_indices = @transform_7, window_bounds = array<i64: 16, 784>}]} {
    %c0 = arith.constant 0 : index
    %c0_0 = arith.constant 0 : index
    %0 = vector.load %arg1[%c0, %c0_0] : memref<16x100xf32, #tpu.memory_space<vmem>>, vector<16x100xf32>
    %c0_1 = arith.constant 0 : index
    %c0_2 = arith.constant 0 : index
    %1 = vector.load %arg2[%c0_1, %c0_2] : memref<100x256xf32, #tpu.memory_space<vmem>>, vector<100x256xf32>
    %cst = arith.constant dense<0.000000e+00> : vector<16x256xf32>
    %2 = tpu.matmul %0, %1, %cst {dimension_numbers = #tpu.dot_dimension_numbers<[1], [0], [0], [1], [0, 0, 1, 1], [], []>} : vector<16x100xf32>, vector<100x256xf32>, vector<16x256xf32> -> vector<16x256xf32>
    %c0_3 = arith.constant 0 : index
    %c0_4 = arith.constant 0 : index
    %3 = vector.load %arg3[%c0_3, %c0_4] : memref<1x256xf32, #tpu.memory_space<vmem>>, vector<1x256xf32>
    %4 = vector.broadcast %3 : vector<1x256xf32> to vector<16x256xf32>
    %5 = arith.addf %2, %4 : vector<16x256xf32>
    %cst_5 = arith.constant 0.000000e+00 : f32
    %6 = vector.broadcast %cst_5 : f32 to vector<16x256xf32>
    %7 = arith.maximumf %5, %6 : vector<16x256xf32>
    %8 = arith.truncf %7 : vector<16x256xf32> to vector<16x256xbf16>
    %c0_6 = arith.constant 0 : index
    %c0_7 = arith.constant 0 : index
    %9 = vector.load %arg4[%c0_6, %c0_7] : memref<256x256xbf16, #tpu.memory_space<vmem>>, vector<256x256xbf16>
    %cst_8 = arith.constant dense<0.000000e+00> : vector<16x256xf32>
    %10 = tpu.matmul %8, %9, %cst_8 {dimension_numbers = #tpu.dot_dimension_numbers<[1], [0], [0], [1], [0, 0, 1, 1], [], []>} : vector<16x256xbf16>, vector<256x256xbf16>, vector<16x256xf32> -> vector<16x256xf32>
    %c0_9 = arith.constant 0 : index
    %c0_10 = arith.constant 0 : index
    %11 = vector.load %arg5[%c0_9, %c0_10] : memref<1x256xf32, #tpu.memory_space<vmem>>, vector<1x256xf32>
    %12 = vector.broadcast %11 : vector<1x256xf32> to vector<16x256xf32>
    %13 = arith.addf %10, %12 : vector<16x256xf32>
    %cst_11 = arith.constant 0.000000e+00 : f32
    %14 = vector.broadcast %cst_11 : f32 to vector<16x256xf32>
    %15 = arith.maximumf %13, %14 : vector<16x256xf32>
    %16 = arith.truncf %15 : vector<16x256xf32> to vector<16x256xbf16>
    %c0_12 = arith.constant 0 : index
    %c0_13 = arith.constant 0 : index
    %17 = vector.load %arg6[%c0_12, %c0_13] : memref<256x784xbf16, #tpu.memory_space<vmem>>, vector<256x784xbf16>
    %cst_14 = arith.constant dense<0.000000e+00> : vector<16x784xf32>
    %18 = tpu.matmul %16, %17, %cst_14 {dimension_numbers = #tpu.dot_dimension_numbers<[1], [0], [0], [1], [0, 0, 1, 1], [], []>} : vector<16x256xbf16>, vector<256x784xbf16>, vector<16x784xf32> -> vector<16x784xf32>
    %c0_15 = arith.constant 0 : index
    %c0_16 = arith.constant 0 : index
    %19 = vector.load %arg7[%c0_15, %c0_16] : memref<1x784xf32, #tpu.memory_space<vmem>>, vector<1x784xf32>
    %20 = vector.broadcast %19 : vector<1x784xf32> to vector<16x784xf32>
    %21 = arith.addf %18, %20 : vector<16x784xf32>
    %22 = arith.truncf %21 : vector<16x784xf32> to vector<16x784xbf16>
    %c0_17 = arith.constant 0 : index
    %c0_18 = arith.constant 0 : index
    %23 = vector.load %arg8[%c0_17, %c0_18] : memref<16x784xbf16, #tpu.memory_space<vmem>>, vector<16x784xbf16>
    tpu.vector_store %arg8[%c0_17, %c0_18], %22 {strides = array<i32>} : memref<16x784xbf16, #tpu.memory_space<vmem>>, vector<16x784xbf16>,
    return
  }
  func.func @transform_0(%arg0: i32) -> (i32, i32) {
    %c0_i32 = arith.constant 0 : i32
    %c0_i32_0 = arith.constant 0 : i32
    return %arg0, %c0_i32 : i32, i32
  }
  func.func @transform_1(%arg0: i32) -> (i32, i32) {
    %c0_i32 = arith.constant 0 : i32
    %c0_i32_0 = arith.constant 0 : i32
    %c0_i32_1 = arith.constant 0 : i32
    return %c0_i32, %c0_i32_0 : i32, i32
  }
  func.func @transform_2(%arg0: i32) -> (i32, i32) {
    %c0_i32 = arith.constant 0 : i32
    %c0_i32_0 = arith.constant 0 : i32
    %c0_i32_1 = arith.constant 0 : i32
    return %c0_i32, %c0_i32_0 : i32, i32
  }
  func.func @transform_3(%arg0: i32) -> (i32, i32) {
    %c0_i32 = arith.constant 0 : i32
    %c0_i32_0 = arith.constant 0 : i32
    %c0_i32_1 = arith.constant 0 : i32
    return %c0_i32, %c0_i32_0 : i32, i32
  }
  func.func @transform_4(%arg0: i32) -> (i32, i32) {
    %c0_i32 = arith.constant 0 : i32
    %c0_i32_0 = arith.constant 0 : i32
    %c0_i32_1 = arith.constant 0 : i32
    return %c0_i32, %c0_i32_0 : i32, i32
  }
  func.func @transform_5(%arg0: i32) -> (i32, i32) {
    %c0_i32 = arith.constant 0 : i32
    %c0_i32_0 = arith.constant 0 : i32
    %c0_i32_1 = arith.constant 0 : i32
    return %c0_i32, %c0_i32_0 : i32, i32
  }
  func.func @transform_6(%arg0: i32) -> (i32, i32) {
    %c0_i32 = arith.constant 0 : i32
    %c0_i32_0 = arith.constant 0 : i32
    %c0_i32_1 = arith.constant 0 : i32
    return %c0_i32, %c0_i32_0 : i32, i32
  }
  func.func @transform_7(%arg0: i32) -> (i32, i32) {
    %c0_i32 = arith.constant 0 : i32
    %c0_i32_0 = arith.constant 0 : i32
    return %arg0, %c0_i32 : i32, i32
  }
}

</mosaic_0001>

<bundles_post_ra>
// kernel: tpu_custom_call.1
= control target key start
LH: loop header
LB: loop body
LE: loop exit
PB: predicated region body
PF: predicated region fallthrough
CT: control target
= control target key end

     0   :  { %v1844_v7 = vmov 0.0   ;;  %vm75_vm0 = vcmask 1043456   ;;  %vm68_vm1 = vcmask 818176   ;;  %s2452_s0 = inlined_call_operand.vmem [shape: f32[16,100], index: 0, kind: input, shape index: {}]   ;;  %s2453_s1 = inlined_call_operand.vmem [shape: f32[100,256], index: 1, kind: input, shape index: {}]   ;;  %s2454_s2 = inlined_call_operand.vmem [shape: f32[1,256], index: 2, kind: input, shape index: {}]   ;;  %s2455_s3 = inlined_call_operand.vmem [shape: bf16[256,256], index: 3, kind: input, shape index: {}]   ;;  %s2456_s4 = inlined_call_operand.vmem [shape: f32[1,256], index: 4, kind: input, shape index: {}]   ;;  %s2457_s5 = inlined_call_operand.vmem [shape: bf16[256,784], index: 5, kind: input, shape index: {}]   ;;  %s2458_s6 = inlined_call_operand.vmem [shape: f32[1,784], index: 6, kind: input, shape index: {}]   ;;  %s2459_s7 = inlined_call_operand.hbm [shape: bf16[16,784], index: 7, kind: output, shape index: {}]  }
   0x1   :  { %v31_v0 = vld [vmem:[%s2453_s1 + $0x8] sm:$0xff]  ;;  %v33_v1 = vld [vmem:[%s2453_s1 + $0x18] sm:$0xff]  ;;  %v30_v2 = vld [vmem:[%s2453_s1] sm:$0xff]  ;;  %146 = vmatprep.mubr.f32.mxu0 %v1844_v7 }
   0x2   :  { %v1584_v3 = vpack.c.bf16 %v33_v1, %v31_v0  ;;  %v32_v4 = vld [vmem:[%s2453_s1 + $0x10] sm:$0xff]  ;;  %v35_v5 = vld [vmem:[%s2453_s1 + $0x28] sm:$0xff]  ;;  %v37_v6 = vld [vmem:[%s2453_s1 + $0x38] sm:$0xff] }
   0x3   :  { %v1586_v8 = vpack.c.bf16 %v32_v4, %v30_v2  ;;  %v1588_v9 = vpack.c.bf16 %v37_v6, %v35_v5  ;;  %v34_v10 = vld [vmem:[%s2453_s1 + $0x20] sm:$0xff]  ;;  %v36_v11 = vld [vmem:[%s2453_s1 + $0x30] sm:$0xff]  ;;  %v39_v12 = vld [vmem:[%s2453_s1 + $0x48] sm:$0xff] }
   0x4   :  { %1585 = vmatprep.subr.bf16.mxu0 %v1584_v3  ;;  %v41_v13 = vld [vmem:[%s2453_s1 + $0x58] sm:$0xff]  ;;  %v1590_v14 = vpack.c.bf16 %v36_v11, %v34_v10  ;;  %v38_v16 = vld [vmem:[%s2453_s1 + $0x40] sm:$0xff]  ;;  %v40_v17 = vld [vmem:[%s2453_s1 + $0x50] sm:$0xff] }
   0x5   :  { %1587 = vmatpush1.bf16.msra.mxu0 %v1586_v8  ;;  %v1592_v15 = vpack.c.bf16 %v41_v13, %v39_v12  ;;  %v43_v18 = vld [vmem:[%s2453_s1 + $0x68] sm:$0xff]  ;;  %v45_v19 = vld [vmem:[%s2453_s1 + $0x78] sm:$0xff]  ;;  %v1594_v20 = vpack.c.bf16 %v40_v17, %v38_v16  ;;  %v42_v21 = vld [vmem:[%s2453_s1 + $0x60] sm:$0xff] }
   0x6   :  { %1589 = vmatprep.subr.bf16.mxu0 %v1588_v9  ;;  %v44_v22 = vld [vmem:[%s2453_s1 + $0x70] sm:$0xff]  ;;  %v47_v23 = vld [vmem:[%s2453_s1 + $0x88] sm:$0xff]  ;;  %v1596_v24 = vpack.c.bf16 %v45_v19, %v43_v18  ;;  %v49_v25 = vld [vmem:[%s2453_s1 + $0x98] sm:$0xff] }
   0x7   :  { %v1612_v26 = vld [vmem:[%s2455_s3 + $0x4] ss:$8 sps:$4 sm:$0xff]   ;;  %v1614_v27 = vld [vmem:[%s2455_s3] ss:$8 sps:$4 sm:$0xff]   ;;  %v48_v29 = vld [vmem:[%s2453_s1 + $0x90] sm:$0xff]  ;;  %v1598_v31 = vpack.c.bf16 %v44_v22, %v42_v21  ;;  %v1600_v33 = vpack.c.bf16 %v49_v25, %v47_v23 }
   0x8   :  { %v46_v28 = vld [vmem:[%s2453_s1 + $0x80] sm:$0xff]  ;;  %v1615_v30 = vld [vmem:[%s2455_s3 + $0x14] ss:$8 sps:$4 sm:$0xff]   ;;  %v51_v32 = vld [vmem:[%s2453_s1 + $0xa8] sm:$0xff]  ;;  %369 = vmatprep.subr.bf16.mxu1 %v1612_v26 }
   0x9   :  { %1591 = vmatpush1.bf16.msra.mxu0 %v1590_v14  ;;  %370 = vmatpush1.bf16.msra.mxu1 %v1614_v27  ;;  %v1617_v34 = vld [vmem:[%s2455_s3 + $0x10] ss:$8 sps:$4 sm:$0xff]   ;;  %v1618_v36 = vld [vmem:[%s2455_s3 + $0x24] ss:$8 sps:$4 sm:$0xff]   ;;  %v1602_v38 = vpack.c.bf16 %v48_v29, %v46_v28  ;;  %v1620_v41 = vld [vmem:[%s2455_s3 + $0x20] ss:$8 sps:$4 sm:$0xff]  }
   0xa   :  { %1593 = vmatprep.subr.bf16.mxu0 %v1592_v15  ;;  %v53_v35 = vld [vmem:[%s2453_s1 + $0xb8] sm:$0xff]  ;;  %371 = vmatprep.subr.bf16.mxu1 %v1615_v30  ;;  %v50_v37 = vld [vmem:[%s2453_s1 + $0xa0] sm:$0xff]  ;;  %v52_v39 = vld [vmem:[%s2453_s1 + $0xb0] sm:$0xff] }
   0xb   :  { %v1604_v40 = vpack.c.bf16 %v53_v35, %v51_v32  ;;  %v1621_v42 = vld [vmem:[%s2455_s3 + $0x34] ss:$8 sps:$4 sm:$0xff]   ;;  %v1606_v43 = vpack.c.bf16 %v52_v39, %v50_v37  ;;  %v1623_v44 = vld [vmem:[%s2455_s3 + $0x30] ss:$8 sps:$4 sm:$0xff]   ;;  %v55_v45 = vld [vmem:[%s2453_s1 + $0xc8] sm:$0xf] }
   0xc   :  { %v1624_v46 = vld [vmem:[%s2455_s3 + $0x44] ss:$8 sps:$4 sm:$0xff]   ;;  %v54_v47 = vld [vmem:[%s2453_s1 + $0xc0] sm:$0xf]  ;;  %v1627_v50 = vld [vmem:[%s2455_s3 + $0x54] ss:$8 sps:$4 sm:$0xff]  }
   0xd   :  { %1595 = vmatpush1.bf16.msra.mxu0 %v1594_v20  ;;  %372 = vmatpush1.bf16.msra.mxu1 %v1617_v34  ;;  %v1626_v48 = vld [vmem:[%s2455_s3 + $0x40] ss:$8 sps:$4 sm:$0xff]   ;;  %v1629_v51 = vld [vmem:[%s2455_s3 + $0x50] ss:$8 sps:$4 sm:$0xff]   ;;  %v1630_v53 = vld [vmem:[%s2455_s3 + $0x64] ss:$8 sps:$4 sm:$0xff]  }
   0xe   :  { %1597 = vmatprep.subr.bf16.mxu0 %v1596_v24  ;;  %373 = vmatprep.subr.bf16.mxu1 %v1618_v36  ;;  %v28_v49 = vld [vmem:[%s2452_s0] sm:$0xff]  ;;  %v29_v52 = vld [vmem:[%s2452_s0 + $0x8] sm:$0xff]  ;;  %v1633_v55 = vld [vmem:[%s2455_s3 + $0x74] ss:$8 sps:$4 sm:$0xff]  }
   0xf   :  { %v1632_v54 = vld [vmem:[%s2455_s3 + $0x60] ss:$8 sps:$4 sm:$0xff]   ;;  %v1635_v56 = vld [vmem:[%s2455_s3 + $0x70] ss:$8 sps:$4 sm:$0xff]   ;;  %v1636_v57 = vld [vmem:[%s2455_s3 + $0x84] ss:$8 sps:$4 sm:$0xff]  }
  0x10   :  { %v1638_v58 = vld [vmem:[%s2455_s3 + $0x80] ss:$8 sps:$4 sm:$0xff]   ;;  %v1639_v59 = vld [vmem:[%s2455_s3 + $0x94] ss:$8 sps:$4 sm:$0xff]   ;;  %v1641_v60 = vld [vmem:[%s2455_s3 + $0x90] ss:$8 sps:$4 sm:$0xff]  }
  0x11   :  { %1599 = vmatpush1.bf16.msra.mxu0 %v1598_v31  ;;  %374 = vmatpush1.bf16.msra.mxu1 %v1620_v41  ;;  %v1642_v61 = vld [vmem:[%s2455_s3 + $0xa4] ss:$8 sps:$4 sm:$0xff]   ;;  %v1644_v62 = vld [vmem:[%s2455_s3 + $0xa0] ss:$8 sps:$4 sm:$0xff]   ;;  %v1645_v63 = vld [vmem:[%s2455_s3 + $0xb4] ss:$8 sps:$4 sm:$0xff]  }
  0x12   :  { %1601 = vmatprep.subr.bf16.mxu0 %v1600_v33  ;;  %375 = vmatprep.subr.bf16.mxu1 %v1621_v42  ;;  %v1647_v0 = vld [vmem:[%s2455_s3 + $0xb0] ss:$8 sps:$4 sm:$0xff]   ;;  %v1648_v1 = vld [vmem:[%s2455_s3 + $0xc4] ss:$8 sps:$4 sm:$0xff]   ;;  %v1650_v2 = vld [vmem:[%s2455_s3 + $0xc0] ss:$8 sps:$4 sm:$0xff]  }
  0x15   :  { %1603 = vmatpush1.bf16.msra.mxu0 %v1602_v38  ;;  %376 = vmatpush1.bf16.msra.mxu1 %v1623_v44 }
  0x16   :  { %1605 = vmatprep.subr.bf16.mxu0 %v1604_v40  ;;  %377 = vmatprep.subr.bf16.mxu1 %v1624_v46 }
  0x19   :  { %1607 = vmatpush1.bf16.msra.mxu0 %v1606_v43  ;;  %378 = vmatpush1.bf16.msra.mxu1 %v1626_v48 }
  0x1a   :  { %1398 = vmatprep.subr.msk.mxu0 %vm75_vm0, %v55_v45  ;;  %379 = vmatprep.subr.bf16.mxu1 %v1627_v50 }
  0x1d   :  { %1399 = vmatpush1.msk.msra.mxu0 %vm75_vm0, %v54_v47  ;;  %380 = vmatpush1.bf16.msra.mxu1 %v1629_v51 }
  0x1e   :  { %1400 = vmatmul.mubr.msk.f32.vlgmr.msra.gmra.mrb[0].mxu0 %vm68_vm1, %v28_v49  ;;  %381 = vmatprep.subr.bf16.mxu1 %v1630_v53 }
  0x1f   :  { %152 = vmatprep.mubr.f32.mxu0 %v1844_v7 }
  0x21   :  { %382 = vmatpush1.bf16.msra.mxu1 %v1632_v54 }
  0x22   :  { %1401 = vmatmul.mubr.msk.f32.gmra.mrb[2].mxu0 %vm68_vm1, %v29_v52  ;;  %383 = vmatprep.subr.bf16.mxu1 %v1633_v55 }
  0x25   :  { %384 = vmatpush1.bf16.msra.mxu1 %v1635_v56 }
  0x26   :  { %385 = vmatprep.subr.bf16.mxu1 %v1636_v57 }
  0x29   :  { %386 = vmatpush1.bf16.msra.mxu1 %v1638_v58 }
  0x2a   :  { %387 = vmatprep.subr.bf16.mxu1 %v1639_v59 }
  0x2d   :  { %388 = vmatpush1.bf16.msra.mxu1 %v1641_v60 }
  0x2e   :  { %389 = vmatprep.subr.bf16.mxu1 %v1642_v61 }
  0x31   :  { %390 = vmatpush1.bf16.msra.mxu1 %v1644_v62 }
  0x32   :  { %391 = vmatprep.subr.bf16.mxu1 %v1645_v63 }
  0x35   :  { %392 = vmatpush1.bf16.msra.mxu1 %v1647_v0 }
  0x36   :  { %393 = vmatprep.subr.bf16.mxu1 %v1648_v1 }
  0x39   :  { %394 = vmatpush1.bf16.msra.mxu1 %v1650_v2 }
  0x3a   :  { %12 = vsyncpa [#allocation3], 0  ;;  %v1651_v3 = vld [vmem:[%s2455_s3 + $0xd4] ss:$8 sps:$4 sm:$0xff]   ;;  %v1653_v4 = vld [vmem:[%s2455_s3 + $0xd0] ss:$8 sps:$4 sm:$0xff]   ;;  %v58_v38 = vlaneseq }
  0x3b   :  { %395 = vmatprep.subr.bf16.mxu1 %v1651_v3  ;;  %v1654_v5 = vld [vmem:[%s2455_s3 + $0xe4] ss:$8 sps:$4 sm:$0xff]   ;;  %v1656_v6 = vld [vmem:[%s2455_s3 + $0xe0] ss:$8 sps:$4 sm:$0xff]   ;;  %v1657_v7 = vld [vmem:[%s2455_s3 + $0xf4] ss:$8 sps:$4 sm:$0xff]  }
  0x3c   :  { %v1659_v8 = vld [vmem:[%s2455_s3 + $0xf0] ss:$8 sps:$4 sm:$0xff]   ;;  %v1660_v9 = vld [vmem:[%s2457_s5] ss:$28 sps:$4 sm:$0xff]   ;;  %v1665_v11 = vld [vmem:[%s2457_s5 + $0xc] ss:$28 sps:$4 sm:$0xff]  }
  0x3d   :  { %396 = vmatpush1.bf16.msra.mxu1 %v1653_v4  ;;  %v1662_v10 = vld [vmem:[%s2457_s5 + $0x4] ss:$28 sps:$4 sm:$0xff]   ;;  %v1668_v12 = vld [vmem:[%s2457_s5 + $0x3c] ss:$28 sps:$4 sm:$0xff]   ;;  %v1674_v14 = vld [vmem:[%s2457_s5 + $0x74] ss:$28 sps:$4 sm:$0xff]  }
  0x3e   :  { %397 = vmatprep.subr.bf16.mxu1 %v1654_v5  ;;  %1159 = vmatprep.subr.bf16.mxu0 %v1662_v10  ;;  %v1666_v13 = vld [vmem:[%s2457_s5 + $0x38] ss:$28 sps:$4 sm:$0xff]   ;;  %v1672_v15 = vld [vmem:[%s2457_s5 + $0x70] ss:$28 sps:$4 sm:$0xff]   ;;  %v1678_v17 = vld [vmem:[%s2457_s5 + $0xa8] ss:$28 sps:$4 sm:$0xff]  }
  0x3f   :  { %1160 = vmatpush1.bf16.msra.mxu0 %v1660_v9  ;;  %v1680_v16 = vld [vmem:[%s2457_s5 + $0xac] ss:$28 sps:$4 sm:$0xff]   ;;  %v1686_v18 = vld [vmem:[%s2457_s5 + $0xe4] ss:$28 sps:$4 sm:$0xff]   ;;  %v1692_v20 = vld [vmem:[%s2457_s5 + $0x11c] ss:$28 sps:$4 sm:$0xff]  }
  0x40   :  { %1161 = vmatprep.subr.bf16.mxu0 %v1668_v12  ;;  %v1684_v19 = vld [vmem:[%s2457_s5 + $0xe0] ss:$28 sps:$4 sm:$0xff]   ;;  %v1690_v21 = vld [vmem:[%s2457_s5 + $0x118] ss:$28 sps:$4 sm:$0xff]   ;;  %v1696_v23 = vld [vmem:[%s2457_s5 + $0x150] ss:$28 sps:$4 sm:$0xff]  }
  0x41   :  { %398 = vmatpush1.bf16.msra.mxu1 %v1656_v6  ;;  %v1698_v22 = vld [vmem:[%s2457_s5 + $0x154] ss:$28 sps:$4 sm:$0xff]   ;;  %v1704_v24 = vld [vmem:[%s2457_s5 + $0x18c] ss:$28 sps:$4 sm:$0xff]   ;;  %v1710_v26 = vld [vmem:[%s2457_s5 + $0x1c4] ss:$28 sps:$4 sm:$0xff]  }
  0x42   :  { %399 = vmatprep.subr.bf16.mxu1 %v1657_v7  ;;  %v1702_v25 = vld [vmem:[%s2457_s5 + $0x188] ss:$28 sps:$4 sm:$0xff]   ;;  %v1708_v27 = vld [vmem:[%s2457_s5 + $0x1c0] ss:$28 sps:$4 sm:$0xff]   ;;  %v1714_v29 = vld [vmem:[%s2457_s5 + $0x1f8] ss:$28 sps:$4 sm:$0xff]  }
  0x43   :  { %1162 = vmatpush1.bf16.msra.mxu0 %v1666_v13  ;;  %v1716_v28 = vld [vmem:[%s2457_s5 + $0x1fc] ss:$28 sps:$4 sm:$0xff]   ;;  %v1722_v30 = vld [vmem:[%s2457_s5 + $0x234] ss:$28 sps:$4 sm:$0xff]   ;;  %v1728_v32 = vld [vmem:[%s2457_s5 + $0x26c] ss:$28 sps:$4 sm:$0xff]  }
  0x44   :  { %1163 = vmatprep.subr.bf16.mxu0 %v1674_v14  ;;  %v1720_v31 = vld [vmem:[%s2457_s5 + $0x230] ss:$28 sps:$4 sm:$0xff]   ;;  %v1726_v33 = vld [vmem:[%s2457_s5 + $0x268] ss:$28 sps:$4 sm:$0xff]   ;;  %v1732_v35 = vld [vmem:[%s2457_s5 + $0x2a0] ss:$28 sps:$4 sm:$0xff]  }
  0x45   :  { %400 = vmatpush1.bf16.msra.mxu1 %v1659_v8  ;;  %v1734_v34 = vld [vmem:[%s2457_s5 + $0x2a4] ss:$28 sps:$4 sm:$0xff]   ;;  %v1740_v36 = vld [vmem:[%s2457_s5 + $0x2dc] ss:$28 sps:$4 sm:$0xff]   ;;  %v2157_v39 = vshrl.u32 %v58_v38, 7  ;;  %vm1376_vm2 = vcmask 125952  }
  0x46   :  { %1202 = vmatprep.subr.bf16.mxu1 %v1665_v11  ;;  %v1738_v37 = vld [vmem:[%s2457_s5 + $0x2d8] ss:$28 sps:$4 sm:$0xff]   ;;  %v56_v41 = vld [vmem:[%s2454_s2] sm:$0x3]  ;;  %v1663_v59 = vld [vmem:[%s2457_s5 + $0x8] ss:$28 sps:$4 sm:$0xff]  }
  0x47   :  { %1164 = vmatpush1.bf16.msra.mxu0 %v1672_v15  ;;  %v2160_v40 = vsub.s32 0, %v2157_v39  ;;  %v2166_v42 = vsub.s32 1, %v2157_v39  ;;  %v1671_v60 = vld [vmem:[%s2457_s5 + $0x44] ss:$28 sps:$4 sm:$0xff]   ;;  %v1677_v62 = vld [vmem:[%s2457_s5 + $0x7c] ss:$28 sps:$4 sm:$0xff]  }
  0x48   :  { %1165 = vmatprep.subr.bf16.mxu0 %v1680_v16  ;;  %v1669_v61 = vld [vmem:[%s2457_s5 + $0x40] ss:$28 sps:$4 sm:$0xff]   ;;  %v1675_v63 = vld [vmem:[%s2457_s5 + $0x78] ss:$28 sps:$4 sm:$0xff]   ;;  %v1681_v1 = vld [vmem:[%s2457_s5 + $0xb0] ss:$28 sps:$4 sm:$0xff]  }
  0x49   :  { %v61_v43 = vrot.slane %v56_v41, %v2160_v40  ;;  %v65_v45 = vrot.slane %v56_v41, %v2166_v42  ;;  %v1683_v0 = vld [vmem:[%s2457_s5 + $0xb4] ss:$28 sps:$4 sm:$0xff]   ;;  %v1689_v2 = vld [vmem:[%s2457_s5 + $0xec] ss:$28 sps:$4 sm:$0xff]   ;;  %v1695_v4 = vld [vmem:[%s2457_s5 + $0x124] ss:$28 sps:$4 sm:$0xff]  }
  0x4a   :  { %v1687_v3 = vld [vmem:[%s2457_s5 + $0xe8] ss:$28 sps:$4 sm:$0xff]   ;;  %v1693_v5 = vld [vmem:[%s2457_s5 + $0x120] ss:$28 sps:$4 sm:$0xff]   ;;  %v1699_v7 = vld [vmem:[%s2457_s5 + $0x158] ss:$28 sps:$4 sm:$0xff]  }
  0x4b   :  { %1166 = vmatpush1.bf16.msra.mxu0 %v1678_v17  ;;  %v1701_v6 = vld [vmem:[%s2457_s5 + $0x15c] ss:$28 sps:$4 sm:$0xff]   ;;  %v1707_v8 = vld [vmem:[%s2457_s5 + $0x194] ss:$28 sps:$4 sm:$0xff]   ;;  %v1713_v10 = vld [vmem:[%s2457_s5 + $0x1cc] ss:$28 sps:$4 sm:$0xff]  }
  0x4c   :  { %1167 = vmatprep.subr.bf16.mxu0 %v1686_v18  ;;  %v1705_v9 = vld [vmem:[%s2457_s5 + $0x190] ss:$28 sps:$4 sm:$0xff]   ;;  %v1711_v11 = vld [vmem:[%s2457_s5 + $0x1c8] ss:$28 sps:$4 sm:$0xff]   ;;  %v1717_v13 = vld [vmem:[%s2457_s5 + $0x200] ss:$28 sps:$4 sm:$0xff]  }
  0x4d   :  { %v1719_v12 = vld [vmem:[%s2457_s5 + $0x204] ss:$28 sps:$4 sm:$0xff]   ;;  %v1725_v14 = vld [vmem:[%s2457_s5 + $0x23c] ss:$28 sps:$4 sm:$0xff]   ;;  %v1731_v16 = vld [vmem:[%s2457_s5 + $0x274] ss:$28 sps:$4 sm:$0xff]  }
  0x4e   :  { %v1723_v15 = vld [vmem:[%s2457_s5 + $0x238] ss:$28 sps:$4 sm:$0xff]   ;;  %v1729_v17 = vld [vmem:[%s2457_s5 + $0x270] ss:$28 sps:$4 sm:$0xff]  }
  0x4f   :  { %1168 = vmatpush1.bf16.msra.mxu0 %v1684_v19  ;;  %v1737_v18 = vld [vmem:[%s2457_s5 + $0x2ac] ss:$28 sps:$4 sm:$0xff]  }
  0x50   :  { %1169 = vmatprep.subr.bf16.mxu0 %v1692_v20  ;;  %v1735_v19 = vld [vmem:[%s2457_s5 + $0x2a8] ss:$28 sps:$4 sm:$0xff]  }
  0x51   :  { %v1743_v20 = vld [vmem:[%s2457_s5 + $0x2e4] ss:$28 sps:$4 sm:$0xff]  }
  0x53   :  { %1170 = vmatpush1.bf16.msra.mxu0 %v1690_v21  ;;  %v1741_v21 = vld [vmem:[%s2457_s5 + $0x2e0] ss:$28 sps:$4 sm:$0xff]  }
  0x54   :  { %1171 = vmatprep.subr.bf16.mxu0 %v1698_v22  ;;  %v1746_v22 = vld [vmem:[%s2457_s5 + $0x314] ss:$28 sps:$4 sm:$0xff]  }
  0x57   :  { %1172 = vmatpush1.bf16.msra.mxu0 %v1696_v23  ;;  %v1749_v23 = vld [vmem:[%s2457_s5 + $0x31c] ss:$28 sps:$4 sm:$0xff]  }
  0x58   :  { %1173 = vmatprep.subr.bf16.mxu0 %v1704_v24  ;;  %v1744_v24 = vld [vmem:[%s2457_s5 + $0x310] ss:$28 sps:$4 sm:$0xff]  }
  0x5b   :  { %1174 = vmatpush1.bf16.msra.mxu0 %v1702_v25  ;;  %v1747_v25 = vld [vmem:[%s2457_s5 + $0x318] ss:$28 sps:$4 sm:$0xff]  }
  0x5c   :  { %1175 = vmatprep.subr.bf16.mxu0 %v1710_v26  ;;  %v1752_v26 = vld [vmem:[%s2457_s5 + $0x34c] ss:$28 sps:$4 sm:$0xff]  }
  0x5f   :  { %1176 = vmatpush1.bf16.msra.mxu0 %v1708_v27  ;;  %v1755_v27 = vld [vmem:[%s2457_s5 + $0x354] ss:$28 sps:$4 sm:$0xff]  }
  0x60   :  { %1177 = vmatprep.subr.bf16.mxu0 %v1716_v28  ;;  %v1750_v28 = vld [vmem:[%s2457_s5 + $0x348] ss:$28 sps:$4 sm:$0xff]  }
  0x63   :  { %1178 = vmatpush1.bf16.msra.mxu0 %v1714_v29  ;;  %v1753_v29 = vld [vmem:[%s2457_s5 + $0x350] ss:$28 sps:$4 sm:$0xff]  }
  0x64   :  { %1179 = vmatprep.subr.bf16.mxu0 %v1722_v30  ;;  %v1758_v30 = vld [vmem:[%s2457_s5 + $0x14] ss:$28 sps:$4 sm:$0xff]  }
  0x67   :  { %1180 = vmatpush1.bf16.msra.mxu0 %v1720_v31  ;;  %v1759_v31 = vld [vmem:[%s2457_s5 + $0x1d8] ss:$28 sps:$4 sm:$0xff]  }
  0x68   :  { %1181 = vmatprep.subr.bf16.mxu0 %v1728_v32  ;;  %v197_v32 = vld [vmem:[%s2456_s4] sm:$0x3] }
  0x6b   :  { %1182 = vmatpush1.bf16.msra.mxu0 %v1726_v33  ;;  %v202_v33 = vrot.slane %v197_v32, %v2160_v40 }
  0x6c   :  { %1183 = vmatprep.subr.bf16.mxu0 %v1734_v34  ;;  %v206_v34 = vrot.slane %v197_v32, %v2166_v42  ;;  %v1819_v32 = vld [vmem:[%s2457_s5 + $0x35c] ss:$28 sps:$4 sm:$0xff]  }
  0x6f   :  { %1184 = vmatpush1.bf16.msra.mxu0 %v1732_v35 }
  0x70   :  { %1185 = vmatprep.subr.bf16.mxu0 %v1740_v36 }
  0x73   :  { %1186 = vmatpush1.bf16.msra.mxu0 %v1738_v37 }
  0x74   :  { %1187 = vmatprep.subr.bf16.mxu0 %v1746_v22  ;;  %v1804_v22 = vld [vmem:[%s2457_s5 + $0x244] ss:$28 sps:$4 sm:$0xff]  }
  0x77   :  { %1188 = vmatpush1.bf16.msra.mxu0 %v1744_v24  ;;  %v1807_v24 = vld [vmem:[%s2457_s5 + $0x27c] ss:$28 sps:$4 sm:$0xff]  }
  0x78   :  { %1189 = vmatprep.subr.bf16.mxu0 %v1752_v26  ;;  %v1810_v26 = vld [vmem:[%s2457_s5 + $0x2b4] ss:$28 sps:$4 sm:$0xff]  }
  0x7b   :  { %1190 = vmatpush1.bf16.msra.mxu0 %v1750_v28  ;;  %v1813_v28 = vld [vmem:[%s2457_s5 + $0x2ec] ss:$28 sps:$4 sm:$0xff]  }
  0x7c   :  { %1245 = vmatprep.subr.bf16.mxu0 %v1758_v30  ;;  %v1816_v30 = vld [vmem:[%s2457_s5 + $0x324] ss:$28 sps:$4 sm:$0xff]  }
  0xf1   :  { %v148_v44 = vpop.f32.mrb[0].mxu0 }
  0xf2   :  { %v150_v46 = vpop.f32.mrb[1].mxu0  ;;  %v149_v47 = vadd.f32 %v148_v44, %v61_v43 }
  0xf3   :  { %v151_v48 = vadd.f32 %v150_v46, %v65_v45 }
  0xf4   :  { %v159_v53 = vmax.f32 %v149_v47, 0.0 }
  0xf5   :  { %v154_v49 = vpop.f32.mrb[2].mxu0  ;;  %v160_v55 = vmax.f32 %v151_v48, 0.0 }
  0xf6   :  { %v155_v50 = vadd.f32 %v154_v49, %v61_v43  ;;  %v156_v51 = vpop.f32.mrb[3].mxu0 }
  0xf7   :  { %v157_v52 = vadd.f32 %v156_v51, %v65_v45 }
  0xf8   :  { %v161_v54 = vmax.f32 %v155_v50, 0.0 }
  0xf9   :  { %v162_v56 = vmax.f32 %v157_v52, 0.0  ;;  %v1756_v52 = vld [vmem:[%s2457_s5 + $0x10] ss:$28 sps:$4 sm:$0xff]  }
  0xfa   :  { %v163_v57 = vpack.c.bf16 %v161_v54, %v159_v53  ;;  %v1760_v53 = vld [vmem:[%s2457_s5 + $0x18] ss:$28 sps:$4 sm:$0xff]   ;;  %v1763_v54 = vld [vmem:[%s2457_s5 + $0x4c] ss:$28 sps:$4 sm:$0xff]  }
  0xfb   :  { %v164_v58 = vpack.c.bf16 %v162_v56, %v160_v55  ;;  %v1764_v55 = vld [vmem:[%s2457_s5 + $0x210] ss:$28 sps:$4 sm:$0xff]   ;;  %v1761_v56 = vld [vmem:[%s2457_s5 + $0x48] ss:$28 sps:$4 sm:$0xff]  }
  0xfd   :  { %401 = vmatprep.mubr.bf16.mxu1 %v164_v58  ;;  %v1768_v58 = vld [vmem:[%s2457_s5 + $0x84] ss:$28 sps:$4 sm:$0xff]  }
  0xfe   :  { %402 = vmatmul.mubr.bf16.vlgmr.msra.gmra.mrb[0].mxu1 %v163_v57  ;;  %v1765_v57 = vld [vmem:[%s2457_s5 + $0x50] ss:$28 sps:$4 sm:$0xff]  }
  0xff   :  { %1203 = vmatpush1.bf16.msra.mxu1 %v1663_v59  ;;  %v1769_v59 = vld [vmem:[%s2457_s5 + $0x248] ss:$28 sps:$4 sm:$0xff]  }
 0x100   :  { %1204 = vmatprep.subr.bf16.mxu1 %v1671_v60  ;;  %v1766_v60 = vld [vmem:[%s2457_s5 + $0x80] ss:$28 sps:$4 sm:$0xff]  }
 0x103   :  { %1205 = vmatpush1.bf16.msra.mxu1 %v1669_v61  ;;  %v1770_v61 = vld [vmem:[%s2457_s5 + $0x88] ss:$28 sps:$4 sm:$0xff]  }
 0x104   :  { %1206 = vmatprep.subr.bf16.mxu1 %v1677_v62  ;;  %v1773_v62 = vld [vmem:[%s2457_s5 + $0xbc] ss:$28 sps:$4 sm:$0xff]  }
 0x107   :  { %1207 = vmatpush1.bf16.msra.mxu1 %v1675_v63  ;;  %v1774_v63 = vld [vmem:[%s2457_s5 + $0x280] ss:$28 sps:$4 sm:$0xff]  }
 0x108   :  { %1208 = vmatprep.subr.bf16.mxu1 %v1683_v0  ;;  %v1771_v0 = vld [vmem:[%s2457_s5 + $0xb8] ss:$28 sps:$4 sm:$0xff]  }
 0x10b   :  { %1209 = vmatpush1.bf16.msra.mxu1 %v1681_v1  ;;  %v1775_v1 = vld [vmem:[%s2457_s5 + $0xc0] ss:$28 sps:$4 sm:$0xff]  }
 0x10c   :  { %1210 = vmatprep.subr.bf16.mxu1 %v1689_v2  ;;  %v1778_v2 = vld [vmem:[%s2457_s5 + $0xf4] ss:$28 sps:$4 sm:$0xff]  }
 0x10f   :  { %1211 = vmatpush1.bf16.msra.mxu1 %v1687_v3  ;;  %v1779_v3 = vld [vmem:[%s2457_s5 + $0x2b8] ss:$28 sps:$4 sm:$0xff]  }
 0x110   :  { %1212 = vmatprep.subr.bf16.mxu1 %v1695_v4  ;;  %v1776_v4 = vld [vmem:[%s2457_s5 + $0xf0] ss:$28 sps:$4 sm:$0xff]  }
 0x113   :  { %1213 = vmatpush1.bf16.msra.mxu1 %v1693_v5  ;;  %v1780_v5 = vld [vmem:[%s2457_s5 + $0xf8] ss:$28 sps:$4 sm:$0xff]  }
 0x114   :  { %1214 = vmatprep.subr.bf16.mxu1 %v1701_v6  ;;  %v1783_v6 = vld [vmem:[%s2457_s5 + $0x12c] ss:$28 sps:$4 sm:$0xff]  }
 0x117   :  { %1215 = vmatpush1.bf16.msra.mxu1 %v1699_v7  ;;  %v1784_v7 = vld [vmem:[%s2457_s5 + $0x2f0] ss:$28 sps:$4 sm:$0xff]  }
 0x118   :  { %1216 = vmatprep.subr.bf16.mxu1 %v1707_v8  ;;  %v1781_v8 = vld [vmem:[%s2457_s5 + $0x128] ss:$28 sps:$4 sm:$0xff]  }
 0x11b   :  { %1217 = vmatpush1.bf16.msra.mxu1 %v1705_v9  ;;  %v1785_v9 = vld [vmem:[%s2457_s5 + $0x130] ss:$28 sps:$4 sm:$0xff]  }
 0x11c   :  { %1218 = vmatprep.subr.bf16.mxu1 %v1713_v10  ;;  %v1788_v10 = vld [vmem:[%s2457_s5 + $0x164] ss:$28 sps:$4 sm:$0xff]  }
 0x11f   :  { %1219 = vmatpush1.bf16.msra.mxu1 %v1711_v11  ;;  %v1789_v11 = vld [vmem:[%s2457_s5 + $0x328] ss:$28 sps:$4 sm:$0xff]  }
 0x120   :  { %1220 = vmatprep.subr.bf16.mxu1 %v1719_v12  ;;  %v1786_v12 = vld [vmem:[%s2457_s5 + $0x160] ss:$28 sps:$4 sm:$0xff]  }
 0x123   :  { %1221 = vmatpush1.bf16.msra.mxu1 %v1717_v13  ;;  %v1790_v13 = vld [vmem:[%s2457_s5 + $0x168] ss:$28 sps:$4 sm:$0xff]  }
 0x124   :  { %1222 = vmatprep.subr.bf16.mxu1 %v1725_v14  ;;  %v1793_v14 = vld [vmem:[%s2457_s5 + $0x19c] ss:$28 sps:$4 sm:$0xff]  }
 0x127   :  { %1223 = vmatpush1.bf16.msra.mxu1 %v1723_v15  ;;  %v1794_v15 = vld [vmem:[%s2457_s5 + $0x360] ss:$28 sps:$4 sm:$0xff]  }
 0x128   :  { %1224 = vmatprep.subr.bf16.mxu1 %v1731_v16  ;;  %v1791_v16 = vld [vmem:[%s2457_s5 + $0x198] ss:$28 sps:$4 sm:$0xff]  }
 0x12b   :  { %1225 = vmatpush1.bf16.msra.mxu1 %v1729_v17  ;;  %v1795_v17 = vld [vmem:[%s2457_s5 + $0x1a0] ss:$28 sps:$4 sm:$0xff]  }
 0x12c   :  { %1226 = vmatprep.subr.bf16.mxu1 %v1737_v18  ;;  %v1798_v18 = vld [vmem:[%s2457_s5 + $0x1d4] ss:$28 sps:$4 sm:$0xff]  }
 0x12f   :  { %1227 = vmatpush1.bf16.msra.mxu1 %v1735_v19  ;;  %v1796_v19 = vld [vmem:[%s2457_s5 + $0x1d0] ss:$28 sps:$4 sm:$0xff]  }
 0x130   :  { %1228 = vmatprep.subr.bf16.mxu1 %v1743_v20  ;;  %v1801_v20 = vld [vmem:[%s2457_s5 + $0x20c] ss:$28 sps:$4 sm:$0xff]  }
 0x133   :  { %1229 = vmatpush1.bf16.msra.mxu1 %v1741_v21  ;;  %v1799_v21 = vld [vmem:[%s2457_s5 + $0x208] ss:$28 sps:$4 sm:$0xff]  }
 0x134   :  { %1230 = vmatprep.subr.bf16.mxu1 %v1749_v23  ;;  %v1802_v23 = vld [vmem:[%s2457_s5 + $0x240] ss:$28 sps:$4 sm:$0xff]  }
 0x137   :  { %1231 = vmatpush1.bf16.msra.mxu1 %v1747_v25  ;;  %v1805_v25 = vld [vmem:[%s2457_s5 + $0x278] ss:$28 sps:$4 sm:$0xff]  }
 0x138   :  { %1232 = vmatprep.subr.bf16.mxu1 %v1755_v27  ;;  %v1808_v27 = vld [vmem:[%s2457_s5 + $0x2b0] ss:$28 sps:$4 sm:$0xff]  }
 0x13b   :  { %1233 = vmatpush1.bf16.msra.mxu1 %v1753_v29  ;;  %v1811_v29 = vld [vmem:[%s2457_s5 + $0x2e8] ss:$28 sps:$4 sm:$0xff]  }
 0x13c   :  { %1562 = vmatprep.subr.bf16.mxu1 %v1759_v31  ;;  %v1814_v31 = vld [vmem:[%s2457_s5 + $0x320] ss:$28 sps:$4 sm:$0xff]  }
 0x1d1   :  { %v403_v35 = vpop.f32.mrb[0].mxu1 }
 0x1d2   :  { %v404_v36 = vadd.f32 %v403_v35, %v202_v33  ;;  %v405_v37 = vpop.f32.mrb[1].mxu1  ;;  %v546_v35 = vld [vmem:[%s2458_s6] sm:$0x7f] }
 0x1d3   :  { %v406_v38 = vadd.f32 %v405_v37, %v206_v34  ;;  %v407_v41 = vpop.f32.mrb[2].mxu1  ;;  %v551_v37 = vrot.slane %v546_v35, %v2160_v40 }
 0x1d4   :  { %v408_v43 = vadd.f32 %v407_v41, %v202_v33  ;;  %v409_v44 = vpop.f32.mrb[3].mxu1  ;;  %v412_v46 = vmax.f32 %v404_v36, 0.0  ;;  %v1817_v33 = vld [vmem:[%s2457_s5 + $0x358] ss:$28 sps:$4 sm:$0xff]   ;;  %v562_v36 = vsub.s32 3, %v2157_v39  ;;  %v555_v41 = vrot.slane %v546_v35, %v2166_v42  ;;  %s1845_s5 = smov [#allocation2]  }
 0x1d5   :  { %v410_v45 = vadd.f32 %v409_v44, %v206_v34  ;;  %v413_v48 = vmax.f32 %v406_v38, 0.0  ;;  %v558_v34 = vsub.s32 2, %v2157_v39  ;;  %s1387_s6 = sshll.u32 %s1845_s5, 4  ;;  %s1388_s6 = int_to_ptr.vmem [resolvable:$true] %s1387_s6 }
 0x1d6   :  { %v414_v47 = vmax.f32 %v408_v43, 0.0  ;;  %v563_v43 = vrot.slane %v546_v35, %v562_v36  ;;  %s1820_s11 = scalar_lea.vmem %s1388_s6, 896  ;;  %p1825_p1 = scmp.lt.s32.totalorder %s1388_s6, %s1388_s6 }
 0x1d7   :  { %v415_v49 = vmax.f32 %v410_v45, 0.0  ;;  %v559_v38 = vrot.slane %v546_v35, %v558_v34  ;;  %p1821_p0 = scmp.ne.s32.totalorder %s1388_s6, %s1820_s11  ;;  %p1826_p2 = scmp.lt.s32.totalorder %s1820_s11, %s1820_s11 }
 0x1d8   :  { %v2286_v50 = vpack.c.bf16 %v414_v47, %v412_v46 }
 0x1d9   :  { %v417_v51 = vpack.c.bf16 %v415_v49, %v413_v48  ;;  %p1827_p3 = por %p1826_p2, %p1825_p1 }
 0x1db   :  { %1191 = vmatprep.mubr.bf16.mxu0 %v417_v51  ;;  %1234 = vmatprep.mubr.bf16.mxu1 %v417_v51  ;;  %p1828_p4 = pnand %p1827_p3, %p1821_p0 }
 0x1dc   :  { %1192 = vmatmul.mubr.bf16.vlgmr.msra.gmra.mrb[4].mxu0 %v2286_v50  ;;  %1235 = vmatmul.mubr.bf16.vlgmr.msra.gmra.mrb[4].mxu1 %v2286_v50 }
 0x1dd   :  { %1246 = vmatpush1.bf16.msra.mxu0 %v1756_v52  ;;  %1563 = vmatpush3.bf16.msra.mxu1 %v1760_v53 }
 0x1de   :  { %1277 = vmatprep.mubr.bf16.mxu0 %v417_v51  ;;  %1320 = vmatprep.mubr.bf16.mxu1 %v417_v51 }
 0x1df   :  { %1247 = vmatprep.subr.bf16.mxu0 %v1763_v54  ;;  %1564 = vmatprep.subr.bf16.mxu1 %v1764_v55 }
 0x1e1   :  { %1248 = vmatpush1.bf16.msra.mxu0 %v1761_v56  ;;  %1565 = vmatpush3.bf16.msra.mxu1 %v1765_v57 }
 0x1e2   :  { %1249 = vmatprep.subr.bf16.mxu0 %v1768_v58  ;;  %1566 = vmatprep.subr.bf16.mxu1 %v1769_v59 }
 0x1e5   :  { %1250 = vmatpush1.bf16.msra.mxu0 %v1766_v60  ;;  %1567 = vmatpush3.bf16.msra.mxu1 %v1770_v61 }
 0x1e6   :  { %1251 = vmatprep.subr.bf16.mxu0 %v1773_v62  ;;  %1568 = vmatprep.subr.bf16.mxu1 %v1774_v63  ;;  %v574_v62 = vsub.s32 6, %v2157_v39 }
 0x1e9   :  { %1252 = vmatpush1.bf16.msra.mxu0 %v1771_v0  ;;  %1569 = vmatpush3.bf16.msra.mxu1 %v1775_v1  ;;  %v575_v0 = vrot.slane %v546_v35, %v574_v62 }
 0x1ea   :  { %1253 = vmatprep.subr.bf16.mxu0 %v1778_v2  ;;  %1570 = vmatprep.subr.bf16.mxu1 %v1779_v3 }
 0x1ed   :  { %1254 = vmatpush1.bf16.msra.mxu0 %v1776_v4  ;;  %1571 = vmatpush3.bf16.msra.mxu1 %v1780_v5 }
 0x1ee   :  { %1255 = vmatprep.subr.bf16.mxu0 %v1783_v6  ;;  %1572 = vmatprep.subr.bf16.mxu1 %v1784_v7 }
 0x1f1   :  { %1256 = vmatpush1.bf16.msra.mxu0 %v1781_v8  ;;  %1573 = vmatpush3.bf16.msra.mxu1 %v1785_v9 }
 0x1f2   :  { %1257 = vmatprep.subr.bf16.mxu0 %v1788_v10  ;;  %1574 = vmatprep.subr.bf16.mxu1 %v1789_v11  ;;  %v566_v10 = vsub.s32 4, %v2157_v39  ;;  %v570_v11 = vsub.s32 5, %v2157_v39 }
 0x1f5   :  { %1258 = vmatpush1.bf16.msra.mxu0 %v1786_v12  ;;  %1575 = vmatpush3.bf16.msra.mxu1 %v1790_v13  ;;  %v567_v12 = vrot.slane %v546_v35, %v566_v10  ;;  %v571_v13 = vrot.slane %v546_v35, %v570_v11 }
 0x1f6   :  { %1259 = vmatprep.subr.bf16.mxu0 %v1793_v14  ;;  %1576 = vmatprep.subr.bf16.mxu1 %v1794_v15 }
 0x1f9   :  { %1260 = vmatpush1.bf16.msra.mxu0 %v1791_v16  ;;  %1577 = vmatpush3.bf16.msra.mxu1 %v1795_v17 }
 0x1fa   :  { %1261 = vmatprep.subr.bf16.mxu0 %v1798_v18 }
 0x1fc   :  { %1321 = vmatmul.mubr.bf16.vlgmr.msra.gmra.mrb[8].mxu1 %v2286_v50 }
 0x1fd   :  { %1262 = vmatpush1.bf16.msra.mxu0 %v1796_v19 }
 0x1fe   :  { %1263 = vmatprep.subr.bf16.mxu0 %v1801_v20 }
 0x201   :  { %1264 = vmatpush1.bf16.msra.mxu0 %v1799_v21 }
 0x202   :  { %1265 = vmatprep.subr.bf16.mxu0 %v1804_v22 }
 0x205   :  { %1266 = vmatpush1.bf16.msra.mxu0 %v1802_v23 }
 0x206   :  { %1267 = vmatprep.subr.bf16.mxu0 %v1807_v24 }
 0x209   :  { %1268 = vmatpush1.bf16.msra.mxu0 %v1805_v25 }
 0x20a   :  { %1269 = vmatprep.subr.bf16.mxu0 %v1810_v26 }
 0x20d   :  { %1270 = vmatpush1.bf16.msra.mxu0 %v1808_v27 }
 0x20e   :  { %1271 = vmatprep.subr.bf16.mxu0 %v1813_v28 }
 0x211   :  { %1272 = vmatpush1.bf16.msra.mxu0 %v1811_v29 }
 0x212   :  { %1273 = vmatprep.subr.bf16.mxu0 %v1816_v30 }
 0x215   :  { %1274 = vmatpush1.bf16.msra.mxu0 %v1814_v31 }
 0x216   :  { %1275 = vmatprep.subr.bf16.mxu0 %v1819_v32 }
 0x219   :  { %1276 = vmatpush1.bf16.msra.mxu0 %v1817_v33 }
 0x21c   :  { %1278 = vmatmul.mubr.bf16.vlgmr.msra.gmra.mrb[8].mxu0 %v2286_v50 }
 0x2af   :  { %v1193_v44 = vpop.f32.mrb[4].mxu0  ;;  %v1236_v45 = vpop.f32.mrb[4].mxu1 }
 0x2b0   :  { %v1194_v46 = vadd.f32 %v1193_v44, %v551_v37  ;;  %v1237_v47 = vadd.f32 %v1236_v45, %v559_v38  ;;  %v1195_v48 = vpop.f32.mrb[5].mxu0  ;;  %v1238_v49 = vpop.f32.mrb[5].mxu1 }
 0x2b1   :  { %v1196_v50 = vadd.f32 %v1195_v48, %v555_v41  ;;  %v1239_v51 = vadd.f32 %v1238_v49, %v563_v43  ;;  %v1197_v52 = vpop.f32.mrb[6].mxu0  ;;  %v1240_v53 = vpop.f32.mrb[6].mxu1 }
 0x2b2   :  { %v1198_v54 = vadd.f32 %v1197_v52, %v551_v37  ;;  %v1241_v55 = vadd.f32 %v1240_v53, %v559_v38  ;;  %v1199_v56 = vpop.f32.mrb[7].mxu0  ;;  %v1242_v57 = vpop.f32.mrb[7].mxu1 }
 0x2b3   :  { %v1554_v58 = vpack.c.bf16 %v1196_v50, %v1194_v46  ;;  %v1555_v40 = vpack.c.bf16 %v1239_v51, %v1237_v47  ;;  %v1200_v59 = vadd.f32 %v1199_v56, %v555_v41  ;;  %v1243_v60 = vadd.f32 %v1242_v57, %v563_v43 }
 0x2b5   :  { %1373 = vst [vmem:[#allocation2] sm:$0xff] %v1554_v58  ;;  %1374 = vst [vmem:[#allocation2 + $0x8] sm:$0xff] %v1555_v40  ;;  %v1558_v42 = vpack.c.bf16 %v1200_v59, %v1198_v54  ;;  %v1559_v61 = vpack.c.bf16 %v1243_v60, %v1241_v55 }
 0x2b7   :  { %1378 = vst [vmem:[#allocation2 + $0x1c] sm:$0xff] %v1558_v42  ;;  %1379 = vst [vmem:[#allocation2 + $0x24] sm:$0xff] %v1559_v61 }
 0x2cf   :  { %v1578_v63 = vpop.f32.mrb[8].mxu1 }
 0x2d0   :  { %v1579_v1 = vpop.f32.mrb[9].mxu1 }
 0x2d1   :  { %v1580_v2 = vadd.f32 %v1579_v1, %v1578_v63  ;;  %v1581_v3 = vpop.f32.mrb[10].mxu1 }
 0x2d2   :  { %v1582_v4 = vpop.f32.mrb[11].mxu1 }
 0x2d3   :  { %v1323_v5 = vadd.f32 %v1580_v2, %v575_v0  ;;  %v1583_v6 = vadd.f32 %v1582_v4, %v1581_v3 }
 0x2d5   :  { %v1557_v7 = vpack.c.bf16 %v1323_v5, %v1323_v5  ;;  %v1326_v8 = vadd.f32 %v1583_v6, %v575_v0 }
 0x2d7   :  { %1377 = vst.msk [vmem:[#allocation2 + $0x18] sm:$0xf] %vm1376_vm2, %v1557_v7  ;;  %v1561_v9 = vpack.c.bf16 %v1326_v8, %v1326_v8 }
 0x2d9   :  { %1381 = vst.msk [vmem:[#allocation2 + $0x34] sm:$0xf] %vm1376_vm2, %v1561_v9 }
 0x2ef   :  { %v1279_v14 = vpop.f32.mrb[8].mxu0 }
 0x2f0   :  { %v1280_v15 = vadd.f32 %v1279_v14, %v567_v12  ;;  %v1281_v16 = vpop.f32.mrb[9].mxu0 }
 0x2f1   :  { %v1282_v17 = vadd.f32 %v1281_v16, %v571_v13  ;;  %v1283_v18 = vpop.f32.mrb[10].mxu0 }
 0x2f2   :  { %v1284_v19 = vadd.f32 %v1283_v18, %v567_v12  ;;  %v1285_v20 = vpop.f32.mrb[11].mxu0 }
 0x2f3   :  { %v1556_v21 = vpack.c.bf16 %v1282_v17, %v1280_v15  ;;  %v1286_v22 = vadd.f32 %v1285_v20, %v571_v13 }
 0x2f5   :  { %1375 = vst [vmem:[#allocation2 + $0x10] sm:$0xff] %v1556_v21  ;;  %v1560_v23 = vpack.c.bf16 %v1286_v22, %v1284_v19 }
 0x2f7   :  { %1380 = vst [vmem:[#allocation2 + $0x2c] sm:$0xff] %v1560_v23 }
 0x2f8   :  { %1831 = shalt.err (!%p1828_p4)
}
 0x2f9   :  { %s1832_s14 = scalar_lea.hbm %s2459_s7, 896 }
 0x2fa   :  { %p1833_p5 = scmp.ne.s32.totalorder %s2459_s7, %s1832_s14  ;;  %p1836_p6 = scmp.lt.u32.totalorder %s1832_s14, %s2459_s7 }
 0x2fc   :  { %p1838_p7 = pnand %p1836_p6, %p1833_p5 }
 0x2fe   :  { %1841 = shalt.err (!%p1838_p7)
}
 0x2ff   :  { %s1846_s18 = smov 448   ;;  %s1847_s19 = smov 28  }
 0x300   :  { %1393 = dma.vmem_to_hbm [thread:$0]  %s1388_s6, 896, %s2459_s7, [#allocation3], %s1846_s18, %s1846_s18, %s1847_s19  }
 0x301   :  { %1842 = dma.done.wait [#allocation3], 896  }
 0x302   :  { %1843 = vsyncadd [#allocation3], 4294966400 }
 0x303   :  { %1397 = vsyncpa [#allocation3], 1 }

</bundles_post_ra>
